<compile_context>
chip_gen: v6e
topology: v6e:2x2x1
jax: 0.10.0
libtpu: 0.0.40
codegen_flags: <defaults>
</compile_context>

<pallas_src>
import functools

import jax
import jax.numpy as jnp
import numpy as np
from jax import lax
from jax.experimental import pallas as pl
from jax.experimental.pallas import tpu as pltpu

LN_EPS = 1e-5
_KV_UNROLL_MAX = 4          # unroll the kv-tile loop when it has <= this many steps


# ----------------------------------------------------------------------------------------------
# Kernel
# ----------------------------------------------------------------------------------------------
def _gt_layer_kernel(x_ref, w_in_t_ref, b_in_ref, w_out_t_ref, b_out_ref,
                     w_lin_t_ref, b_lin_ref, g1_ref, bt1_ref, g2_ref, bt2_ref,
                     o_ref, qkv_ref, ctx_ref, *, B_blk, S, E, H, Dh, Tk):
    """One batch-block: MHA (kv-tiled online softmax) + residual + LN1 + linear + residual + LN2."""
    M = B_blk * S
    cdt = qkv_ref.dtype                       # compute dtype for MXU operands / scratches
    num_kv = S // Tk
    aligned = (S % 8 == 0) and (Tk % 8 == 0)

    def _hint(idx):
        # Sublane-alignment hint for dynamic offsets (skip for static python ints).
        if aligned and not isinstance(idx, int):
            return pl.multiple_of(idx, 8)
        return idx

    # --- in-projection for the whole block (q columns pre-scaled by 1/sqrt(Dh) host-side) ---
    x_in = x_ref[...].reshape(M, E).astype(cdt)
    qkv_ref[...] = (jnp.dot(x_in, w_in_t_ref[...], preferred_element_type=jnp.float32)
                    + b_in_ref[0]).astype(cdt)

    # --- attention: per batch row (pl.loop bounds live ranges), per head, kv-tiled online softmax
    def _attend_one(b):
        row0 = _hint(b * S)
        for h in range(H):
            q_h = qkv_ref[pl.ds(row0, S), h * Dh:(h + 1) * Dh]                  # (S, Dh)

            def kv_step(t, carry):
                m_i, l_i, acc = carry
                kv0 = _hint(row0 + t * Tk)
                k_t = qkv_ref[pl.ds(kv0, Tk), E + h * Dh:E + (h + 1) * Dh]      # (Tk, Dh)
                v_t = qkv_ref[pl.ds(kv0, Tk), 2 * E + h * Dh:2 * E + (h + 1) * Dh]
                # scores = q_h @ k_t^T via dot_general contracting last dims (no XLU transpose)
                s = lax.dot_general(q_h, k_t, (((1,), (1,)), ((), ())),
                                    preferred_element_type=jnp.float32)         # (S, Tk)
                m_new = jnp.maximum(m_i, jnp.max(s, axis=-1, keepdims=True))
                alpha = jnp.exp(m_i - m_new)
                p = jnp.exp(s - m_new)
                l_new = alpha * l_i + jnp.sum(p, axis=-1, keepdims=True)
                acc_new = alpha * acc + jnp.dot(p.astype(cdt), v_t,
                                                preferred_element_type=jnp.float32)
                return m_new, l_new, acc_new

            carry = (jnp.full((S, 1), -jnp.inf, jnp.float32),
                     jnp.zeros((S, 1), jnp.float32),
                     jnp.zeros((S, Dh), jnp.float32))
            if num_kv <= _KV_UNROLL_MAX:
                for t in range(num_kv):                    # short static loop: unrolled
                    carry = kv_step(t, carry)
                m_i, l_i, acc = carry
            else:
                m_i, l_i, acc = lax.fori_loop(0, num_kv, kv_step, carry)

            inv = pl.reciprocal(l_i, approx=True)          # EUP slot (nearly free)
            inv = inv * (2.0 - l_i * inv)                  # one Newton step -> ~f32 accuracy
            # Per-head Dh-wide store at a static lane offset; the out-projection runs once,
            # block-wide, with K = E (full MXU depth) after the loop.
            ctx_ref[pl.ds(row0, S), h * Dh:(h + 1) * Dh] = (acc * inv).astype(cdt)

    if B_blk == 1:
        _attend_one(0)                                     # fully static addressing
    else:
        @pl.loop(0, B_blk)
        def _(b):
            _attend_one(b)

    # --- single block-wide out-projection + residual + LayerNorm 1 (f32) ---
    attn = jnp.dot(ctx_ref[...], w_out_t_ref[...],
                   preferred_element_type=jnp.float32) + b_out_ref[0]           # (M, E) f32
    x_f32 = x_ref[...].reshape(M, E).astype(jnp.float32)   # re-read: x not kept live across attn
    h1 = x_f32 + attn
    mu1 = jnp.mean(h1, axis=-1, keepdims=True)
    var1 = jnp.mean((h1 - mu1) ** 2, axis=-1, keepdims=True)
    n1 = (h1 - mu1) * lax.rsqrt(var1 + LN_EPS) * g1_ref[0] + bt1_ref[0]

    # --- linear + residual + LayerNorm 2 ---
    lin = jnp.dot(n1.astype(cdt), w_lin_t_ref[...],
                  preferred_element_type=jnp.float32) + b_lin_ref[0]
    h2 = n1 + lin
    mu2 = jnp.mean(h2, axis=-1, keepdims=True)
    var2 = jnp.mean((h2 - mu2) ** 2, axis=-1, keepdims=True)
    n2 = (h2 - mu2) * lax.rsqrt(var2 + LN_EPS) * g2_ref[0] + bt2_ref[0]

    o_ref[...] = n2.reshape(B_blk, S, E).astype(o_ref.dtype)


# ----------------------------------------------------------------------------------------------
# Generation-aware VMEM budgeting / tile picking
# ----------------------------------------------------------------------------------------------
def _vmem_capacity_bytes():
    try:
        info = pltpu.get_tpu_info()
        cap = getattr(info, "vmem_capacity_bytes", None)
        if cap:
            return int(cap)
    except Exception:
        pass
    return 64 * 1024 * 1024          # conservative fallback (v7x per-TC)


def _vmem_limits():
    cap = _vmem_capacity_bytes()
    limit = max(32 * 1024 * 1024, min((cap * 3) // 4, 96 * 1024 * 1024))
    limit = min(limit, cap)
    budget = int(limit * 0.8)        # block-picker headroom under the scoped limit
    return limit, budget


def _pick_kv_block(S, cap=512):
    """Largest divisor of S that is <= cap (caps the (S, Tk) score tile)."""
    if S <= cap:
        return S
    for t in range(cap, 0, -1):
        if S % t == 0:
            return t
    return S


def _vmem_footprint_bytes(B_blk, S, E, Tk, H, x_itemsize, out_itemsize, c_itemsize):
    M = B_blk * S
    Dh = E // H
    weights = (3 * E * E + 2 * E * E) * c_itemsize + 9 * E * 4     # Buffered(1) weights + params
    io = 2 * M * E * x_itemsize + 2 * M * E * out_itemsize         # double-buffered in/out blocks
    scratch = 4 * M * E * c_itemsize                               # qkv (M,3E) + ctx (M,E)
    temps = 4 * M * E * 4 + (2 * S * Tk + 2 * S * Dh + 2 * Tk * Dh + 4 * S) * 4
    return weights + io + scratch + temps


def _pick_batch_block(N, S, E, Tk, H, x_dtype, out_dtype, c_dtype, budget):
    """Largest divisor of N fitting the VMEM budget, keeping >=2 grid steps when possible."""
    x_it = jnp.dtype(x_dtype).itemsize
    o_it = jnp.dtype(out_dtype).itemsize
    c_it = jnp.dtype(c_dtype).itemsize
    best = 1
    for cand in range(1, N + 1):
        if N % cand:
            continue
        if N >= 2 and (N // cand) < 2:           # keep >=2 grid steps (megacore / pipelining)
            continue
        if _vmem_footprint_bytes(cand, S, E, Tk, H, x_it, o_it, c_it) <= budget:
            best = cand
    return best


# ----------------------------------------------------------------------------------------------
# Wrapper
# ----------------------------------------------------------------------------------------------
def graph_transformer_layer(x, params, num_heads, *, compute_dtype=None,
                            batch_block=None, kv_block=None):
    """x: (N, S, E). Returns (N, S, E). compute_dtype=jnp.bfloat16 recommended at production E."""
    N, S, E = x.shape
    H = num_heads
    assert E % H == 0
    Dh = E // H

    cdt = jnp.dtype(compute_dtype) if compute_dtype is not None else x.dtype
    xc = x.astype(cdt)

    # Fold the 1/sqrt(Dh) attention scale into the q columns of W_in^T and b_in (zero kernel cost).
    scale = 1.0 / float(np.sqrt(Dh))
    col_scale = jnp.concatenate([jnp.full((E,), scale, jnp.float32),
                                 jnp.ones((2 * E,), jnp.float32)])

    w_in_t = (params["in_proj_weight"].astype(jnp.float32).T * col_scale).astype(cdt)   # (E, 3E)
    b_in = (params["in_proj_bias"].astype(jnp.float32) * col_scale).reshape(1, 3 * E)
    w_out_t = params["out_proj_weight"].T.astype(cdt)                                   # (E, E)
    b_out = params["out_proj_bias"].reshape(1, E).astype(jnp.float32)
    w_lin_t = params["linear_weight"].T.astype(cdt)                                     # (E, E)
    b_lin = params["linear_bias"].reshape(1, E).astype(jnp.float32)
    g1 = params["ln1_weight"].reshape(1, E).astype(jnp.float32)
    bt1 = params["ln1_bias"].reshape(1, E).astype(jnp.float32)
    g2 = params["ln2_weight"].reshape(1, E).astype(jnp.float32)
    bt2 = params["ln2_bias"].reshape(1, E).astype(jnp.float32)

    Tk = kv_block if kv_block is not None else _pick_kv_block(S)
    assert S % Tk == 0

    vmem_limit, budget = _vmem_limits()
    B_blk = batch_block if batch_block is not None else _pick_batch_block(
        N, S, E, Tk, H, xc.dtype, x.dtype, cdt, budget)
    assert N % B_blk == 0
    grid = (N // B_blk,)

    kernel = functools.partial(_gt_layer_kernel, B_blk=B_blk, S=S, E=E, H=H, Dh=Dh, Tk=Tk)

    def _const(shape):
        # Constant-index weights / biases: single-buffered (block index never changes).
        idx = lambda b: (0,) * len(shape)
        try:
            return pl.BlockSpec(shape, idx, pipeline_mode=pl.Buffered(1))
        except Exception:
            return pl.BlockSpec(shape, idx)

    return pl.pallas_call(
        kernel,
        out_shape=jax.ShapeDtypeStruct((N, S, E), x.dtype),
        grid_spec=pltpu.PrefetchScalarGridSpec(
            num_scalar_prefetch=0,
            grid=grid,
            in_specs=[
                pl.BlockSpec((B_blk, S, E), lambda b: (b, 0, 0)),   # x batch-block
                _const((E, 3 * E)),                                 # W_in^T (q cols pre-scaled)
                _const((1, 3 * E)),                                 # b_in
                _const((E, E)),                                     # W_out^T
                _const((1, E)),                                     # b_out
                _const((E, E)),                                     # W_lin^T
                _const((1, E)),                                     # b_lin
                _const((1, E)), _const((1, E)),                     # ln1 gamma/beta
                _const((1, E)), _const((1, E)),                     # ln2 gamma/beta
            ],
            out_specs=pl.BlockSpec((B_blk, S, E), lambda b: (b, 0, 0)),
            scratch_shapes=[pltpu.VMEM((B_blk * S, 3 * E), cdt),    # qkv scratch
                            pltpu.VMEM((B_blk * S, E), cdt)],       # per-head context scratch
        ),
        compiler_params=pltpu.CompilerParams(
            dimension_semantics=("parallel",),
            vmem_limit_bytes=vmem_limit,
        ),
    )(xc, w_in_t, b_in, w_out_t, b_out, w_lin_t, b_lin, g1, bt1, g2, bt2)


# ----------------------------------------------------------------------------------------------
# Pure-JAX reference (mirrors the PyTorch forward, eval mode) and test harness
# ----------------------------------------------------------------------------------------------
def reference_forward(x, params, num_heads):
    N, S, E = x.shape
    H = num_heads
    Dh = E // H
    qkv = x @ params["in_proj_weight"].T + params["in_proj_bias"]
    q, k, v = jnp.split(qkv, 3, axis=-1)

    def heads(t):  # (N, S, E) -> (N, H, S, Dh)
        return t.reshape(N, S, H, Dh).transpose(0, 2, 1, 3)

    qh, kh, vh = heads(q), heads(k), heads(v)
    scores = jnp.einsum("nhqd,nhkd->nhqk", qh, kh) / jnp.sqrt(Dh)
    p = jax.nn.softmax(scores, axis=-1)
    ctx = jnp.einsum("nhqk,nhkd->nhqd", p, vh).transpose(0, 2, 1, 3).reshape(N, S, E)
    attn_out = ctx @ params["out_proj_weight"].T + params["out_proj_bias"]

    def ln(h, w, b):
        mu = jnp.mean(h, axis=-1, keepdims=True)
        var = jnp.mean((h - mu) ** 2, axis=-1, keepdims=True)
        return (h - mu) / jnp.sqrt(var + LN_EPS) * w + b

    h1 = ln(x + attn_out, params["ln1_weight"], params["ln1_bias"])
    lin = h1 @ params["linear_weight"].T + params["linear_bias"]
    return ln(h1 + lin, params["ln2_weight"], params["ln2_bias"])


def make_params(key, hidden):
    ks = jax.random.split(key, 6)
    scale = 0.1
    return {
        "in_proj_weight": scale * jax.random.normal(ks[0], (3 * hidden, hidden), jnp.float32),
        "in_proj_bias": scale * jax.random.normal(ks[1], (3 * hidden,), jnp.float32),
        "out_proj_weight": scale * jax.random.normal(ks[2], (hidden, hidden), jnp.float32),
        "out_proj_bias": scale * jax.random.normal(ks[3], (hidden,), jnp.float32),
        "linear_weight": scale * jax.random.normal(ks[4], (hidden, hidden), jnp.float32),
        "linear_bias": scale * jax.random.normal(ks[5], (hidden,), jnp.float32),
        "ln1_weight": jnp.ones((hidden,), jnp.float32),
        "ln1_bias": jnp.zeros((hidden,), jnp.float32),
        "ln2_weight": jnp.ones((hidden,), jnp.float32),
        "ln2_bias": jnp.zeros((hidden,), jnp.float32),
    }


if __name__ == "__main__":
    k1, k2, k3, k4 = jax.random.split(jax.random.PRNGKey(0), 4)

    # Test 1: required small shape (single kv tile, static single-batch-row path).
    batch, seq, hidden, num_heads = 2, 8, 32, 4
    x = jax.random.normal(k1, (batch, seq, hidden), jnp.float32)
    params = make_params(k2, hidden)
    out = jax.block_until_ready(graph_transformer_layer(x, params, num_heads))
    ref = jax.block_until_ready(reference_forward(x, params, num_heads))
    np.testing.assert_allclose(np.asarray(out), np.asarray(ref), atol=1e-3, rtol=1e-3)

    # Test 2: exercises the pl.loop batch path (B_blk=2) and the kv-tiled online-softmax
    # fori_loop path (S=64, Tk=8 -> 8 kv tiles per head).
    batch2, seq2, hidden2, heads2 = 4, 64, 32, 4
    x2 = jax.random.normal(k3, (batch2, seq2, hidden2), jnp.float32)
    params2 = make_params(k4, hidden2)
    out2 = jax.block_until_ready(
        graph_transformer_layer(x2, params2, heads2, batch_block=2, kv_block=8))
    ref2 = jax.block_until_ready(reference_forward(x2, params2, heads2))
    np.testing.assert_allclose(np.asarray(out2), np.asarray(ref2), atol=1e-3, rtol=1e-3)

    print("KERNEL_OK")
</pallas_src>

<mosaic_0001>
module attributes {stable_mosaic.version = 11 : i64} {
  func.func @_gt_layer_kernel(%arg0: i32, %arg1: memref<1x8x32xf32, #tpu.memory_space<vmem>>, %arg2: memref<32x96xf32, #tpu.memory_space<vmem>>, %arg3: memref<1x96xf32, #tpu.memory_space<vmem>>, %arg4: memref<32x32xf32, #tpu.memory_space<vmem>>, %arg5: memref<1x32xf32, #tpu.memory_space<vmem>>, %arg6: memref<32x32xf32, #tpu.memory_space<vmem>>, %arg7: memref<1x32xf32, #tpu.memory_space<vmem>>, %arg8: memref<1x32xf32, #tpu.memory_space<vmem>>, %arg9: memref<1x32xf32, #tpu.memory_space<vmem>>, %arg10: memref<1x32xf32, #tpu.memory_space<vmem>>, %arg11: memref<1x32xf32, #tpu.memory_space<vmem>>, %arg12: memref<1x8x32xf32, #tpu.memory_space<vmem>>, %arg13: memref<8x96xf32, #tpu.memory_space<vmem>>, %arg14: memref<8x32xf32, #tpu.memory_space<vmem>>) attributes {dimension_semantics = [#tpu.dimension_semantics<parallel>], iteration_bounds = array<i64: 2>, scalar_prefetch = 0 : i64, scratch_operands = 2 : i64, tpu.core_type = #tpu.core_type<tc>, window_params = [{transform_indices = @transform_0, window_bounds = array<i64: 1, 8, 32>}, {pipeline_mode = #tpu.pipeline_mode<synchronous>, transform_indices = @transform_1, window_bounds = array<i64: 32, 96>}, {pipeline_mode = #tpu.pipeline_mode<synchronous>, transform_indices = @transform_2, window_bounds = array<i64: 1, 96>}, {pipeline_mode = #tpu.pipeline_mode<synchronous>, transform_indices = @transform_3, window_bounds = array<i64: 32, 32>}, {pipeline_mode = #tpu.pipeline_mode<synchronous>, transform_indices = @transform_4, window_bounds = array<i64: 1, 32>}, {pipeline_mode = #tpu.pipeline_mode<synchronous>, transform_indices = @transform_5, window_bounds = array<i64: 32, 32>}, {pipeline_mode = #tpu.pipeline_mode<synchronous>, transform_indices = @transform_6, window_bounds = array<i64: 1, 32>}, {pipeline_mode = #tpu.pipeline_mode<synchronous>, transform_indices = @transform_7, window_bounds = array<i64: 1, 32>}, {pipeline_mode = #tpu.pipeline_mode<synchronous>, transform_indices = @transform_8, window_bounds = array<i64: 1, 32>}, {pipeline_mode = #tpu.pipeline_mode<synchronous>, transform_indices = @transform_9, window_bounds = array<i64: 1, 32>}, {pipeline_mode = #tpu.pipeline_mode<synchronous>, transform_indices = @transform_10, window_bounds = array<i64: 1, 32>}, {transform_indices = @transform_11, window_bounds = array<i64: 1, 8, 32>}]} {
    %c0 = arith.constant 0 : index
    %c0_0 = arith.constant 0 : index
    %c0_1 = arith.constant 0 : index
    %0 = vector.load %arg1[%c0, %c0_0, %c0_1] : memref<1x8x32xf32, #tpu.memory_space<vmem>>, vector<1x8x32xf32>
    %1 = vector.shape_cast %0 : vector<1x8x32xf32> to vector<8x32xf32>
    %c0_2 = arith.constant 0 : index
    %c0_3 = arith.constant 0 : index
    %2 = vector.load %arg2[%c0_2, %c0_3] : memref<32x96xf32, #tpu.memory_space<vmem>>, vector<32x96xf32>
    %cst = arith.constant dense<0.000000e+00> : vector<8x96xf32>
    %3 = tpu.matmul %1, %2, %cst {dimension_numbers = #tpu.dot_dimension_numbers<[1], [0], [0], [1], [0, 0, 1, 1], [], []>} : vector<8x32xf32>, vector<32x96xf32>, vector<8x96xf32> -> vector<8x96xf32>
    %c0_4 = arith.constant 0 : index
    %c0_5 = arith.constant 0 : index
    %4 = vector.load %arg3[%c0_4, %c0_5] : memref<1x96xf32, #tpu.memory_space<vmem>>, vector<1x96xf32>
    %5 = vector.shape_cast %4 : vector<1x96xf32> to vector<96xf32>
    %6 = vector.shape_cast %5 : vector<96xf32> to vector<1x96xf32>
    %7 = vector.broadcast %6 : vector<1x96xf32> to vector<8x96xf32>
    %8 = arith.addf %3, %7 : vector<8x96xf32>
    %c0_6 = arith.constant 0 : index
    %c0_7 = arith.constant 0 : index
    %9 = vector.load %arg13[%c0_6, %c0_7] : memref<8x96xf32, #tpu.memory_space<vmem>>, vector<8x96xf32>
    tpu.vector_store %arg13[%c0_6, %c0_7], %8 {strides = array<i32>} : memref<8x96xf32, #tpu.memory_space<vmem>>, vector<8x96xf32>,
    %c0_8 = arith.constant 0 : index
    %c0_9 = arith.constant 0 : index
    %10 = vector.load %arg13[%c0_8, %c0_9] : memref<8x96xf32, #tpu.memory_space<vmem>>, vector<8x8xf32>
    %cst_10 = arith.constant 0xFF800000 : f32
    %11 = vector.broadcast %cst_10 : f32 to vector<8x1xf32>
    %cst_11 = arith.constant 0.000000e+00 : f32
    %12 = vector.broadcast %cst_11 : f32 to vector<8x1xf32>
    %cst_12 = arith.constant 0.000000e+00 : f32
    %13 = vector.broadcast %cst_12 : f32 to vector<8x8xf32>
    %c0_13 = arith.constant 0 : index
    %c32 = arith.constant 32 : index
    %14 = vector.load %arg13[%c0_13, %c32] : memref<8x96xf32, #tpu.memory_space<vmem>>, vector<8x8xf32>
    %c0_14 = arith.constant 0 : index
    %c64 = arith.constant 64 : index
    %15 = vector.load %arg13[%c0_14, %c64] : memref<8x96xf32, #tpu.memory_space<vmem>>, vector<8x8xf32>
    %cst_15 = arith.constant dense<0.000000e+00> : vector<8x8xf32>
    %16 = tpu.matmul %10, %14, %cst_15 {dimension_numbers = #tpu.dot_dimension_numbers<[1], [1], [0], [0], [0, 0, 1, 0], [], []>} : vector<8x8xf32>, vector<8x8xf32>, vector<8x8xf32> -> vector<8x8xf32>
    %cst_16 = arith.constant dense<0xFF800000> : vector<8xf32>
    %17 = vector.multi_reduction <maximumf>, %16, %cst_16 [1] : vector<8x8xf32> to vector<8xf32>
    %18 = vector.shape_cast %17 : vector<8xf32> to vector<8x1xf32>
    %19 = arith.maximumf %11, %18 : vector<8x1xf32>
    %20 = arith.subf %11, %19 : vector<8x1xf32>
    %21 = math.exp %20 : vector<8x1xf32>
    %22 = vector.broadcast %19 : vector<8x1xf32> to vector<8x8xf32>
    %23 = arith.subf %16, %22 : vector<8x8xf32>
    %24 = math.exp %23 : vector<8x8xf32>
    %25 = arith.mulf %21, %12 : vector<8x1xf32>
    %cst_17 = arith.constant dense<0.000000e+00> : vector<8xf32>
    %26 = vector.multi_reduction <add>, %24, %cst_17 [1] : vector<8x8xf32> to vector<8xf32>
    %27 = vector.shape_cast %26 : vector<8xf32> to vector<8x1xf32>
    %28 = arith.addf %25, %27 : vector<8x1xf32>
    %29 = vector.broadcast %21 : vector<8x1xf32> to vector<8x8xf32>
    %30 = arith.mulf %29, %13 : vector<8x8xf32>
    %cst_18 = arith.constant dense<0.000000e+00> : vector<8x8xf32>
    %31 = tpu.matmul %24, %15, %cst_18 {dimension_numbers = #tpu.dot_dimension_numbers<[1], [0], [0], [1], [0, 0, 1, 1], [], []>} : vector<8x8xf32>, vector<8x8xf32>, vector<8x8xf32> -> vector<8x8xf32>
    %32 = arith.addf %30, %31 : vector<8x8xf32>
    %33 = tpu.reciprocal %28 {approx = true} : vector<8x1xf32> -> vector<8x1xf32>
    %34 = arith.mulf %28, %33 : vector<8x1xf32>
    %cst_19 = arith.constant 2.000000e+00 : f32
    %35 = vector.broadcast %cst_19 : f32 to vector<8x1xf32>
    %36 = arith.subf %35, %34 : vector<8x1xf32>
    %37 = arith.mulf %33, %36 : vector<8x1xf32>
    %38 = vector.broadcast %37 : vector<8x1xf32> to vector<8x8xf32>
    %39 = arith.mulf %32, %38 : vector<8x8xf32>
    %c0_20 = arith.constant 0 : index
    %c0_21 = arith.constant 0 : index
    %40 = vector.load %arg14[%c0_20, %c0_21] : memref<8x32xf32, #tpu.memory_space<vmem>>, vector<8x8xf32>
    tpu.vector_store %arg14[%c0_20, %c0_21], %39 {strides = array<i32>} : memref<8x32xf32, #tpu.memory_space<vmem>>, vector<8x8xf32>,
    %c0_22 = arith.constant 0 : index
    %c8 = arith.constant 8 : index
    %41 = vector.load %arg13[%c0_22, %c8] : memref<8x96xf32, #tpu.memory_space<vmem>>, vector<8x8xf32>
    %cst_23 = arith.constant 0xFF800000 : f32
    %42 = vector.broadcast %cst_23 : f32 to vector<8x1xf32>
    %cst_24 = arith.constant 0.000000e+00 : f32
    %43 = vector.broadcast %cst_24 : f32 to vector<8x1xf32>
    %cst_25 = arith.constant 0.000000e+00 : f32
    %44 = vector.broadcast %cst_25 : f32 to vector<8x8xf32>
    %c0_26 = arith.constant 0 : index
    %c40 = arith.constant 40 : index
    %45 = vector.load %arg13[%c0_26, %c40] : memref<8x96xf32, #tpu.memory_space<vmem>>, vector<8x8xf32>
    %c0_27 = arith.constant 0 : index
    %c72 = arith.constant 72 : index
    %46 = vector.load %arg13[%c0_27, %c72] : memref<8x96xf32, #tpu.memory_space<vmem>>, vector<8x8xf32>
    %cst_28 = arith.constant dense<0.000000e+00> : vector<8x8xf32>
    %47 = tpu.matmul %41, %45, %cst_28 {dimension_numbers = #tpu.dot_dimension_numbers<[1], [1], [0], [0], [0, 0, 1, 0], [], []>} : vector<8x8xf32>, vector<8x8xf32>, vector<8x8xf32> -> vector<8x8xf32>
    %cst_29 = arith.constant dense<0xFF800000> : vector<8xf32>
    %48 = vector.multi_reduction <maximumf>, %47, %cst_29 [1] : vector<8x8xf32> to vector<8xf32>
    %49 = vector.shape_cast %48 : vector<8xf32> to vector<8x1xf32>
    %50 = arith.maximumf %42, %49 : vector<8x1xf32>
    %51 = arith.subf %42, %50 : vector<8x1xf32>
    %52 = math.exp %51 : vector<8x1xf32>
    %53 = vector.broadcast %50 : vector<8x1xf32> to vector<8x8xf32>
    %54 = arith.subf %47, %53 : vector<8x8xf32>
    %55 = math.exp %54 : vector<8x8xf32>
    %56 = arith.mulf %52, %43 : vector<8x1xf32>
    %cst_30 = arith.constant dense<0.000000e+00> : vector<8xf32>
    %57 = vector.multi_reduction <add>, %55, %cst_30 [1] : vector<8x8xf32> to vector<8xf32>
    %58 = vector.shape_cast %57 : vector<8xf32> to vector<8x1xf32>
    %59 = arith.addf %56, %58 : vector<8x1xf32>
    %60 = vector.broadcast %52 : vector<8x1xf32> to vector<8x8xf32>
    %61 = arith.mulf %60, %44 : vector<8x8xf32>
    %cst_31 = arith.constant dense<0.000000e+00> : vector<8x8xf32>
    %62 = tpu.matmul %55, %46, %cst_31 {dimension_numbers = #tpu.dot_dimension_numbers<[1], [0], [0], [1], [0, 0, 1, 1], [], []>} : vector<8x8xf32>, vector<8x8xf32>, vector<8x8xf32> -> vector<8x8xf32>
    %63 = arith.addf %61, %62 : vector<8x8xf32>
    %64 = tpu.reciprocal %59 {approx = true} : vector<8x1xf32> -> vector<8x1xf32>
    %65 = arith.mulf %59, %64 : vector<8x1xf32>
    %cst_32 = arith.constant 2.000000e+00 : f32
    %66 = vector.broadcast %cst_32 : f32 to vector<8x1xf32>
    %67 = arith.subf %66, %65 : vector<8x1xf32>
    %68 = arith.mulf %64, %67 : vector<8x1xf32>
    %69 = vector.broadcast %68 : vector<8x1xf32> to vector<8x8xf32>
    %70 = arith.mulf %63, %69 : vector<8x8xf32>
    %c0_33 = arith.constant 0 : index
    %c8_34 = arith.constant 8 : index
    %71 = vector.load %arg14[%c0_33, %c8_34] : memref<8x32xf32, #tpu.memory_space<vmem>>, vector<8x8xf32>
    tpu.vector_store %arg14[%c0_33, %c8_34], %70 {strides = array<i32>} : memref<8x32xf32, #tpu.memory_space<vmem>>, vector<8x8xf32>,
    %c0_35 = arith.constant 0 : index
    %c16 = arith.constant 16 : index
    %72 = vector.load %arg13[%c0_35, %c16] : memref<8x96xf32, #tpu.memory_space<vmem>>, vector<8x8xf32>
    %cst_36 = arith.constant 0xFF800000 : f32
    %73 = vector.broadcast %cst_36 : f32 to vector<8x1xf32>
    %cst_37 = arith.constant 0.000000e+00 : f32
    %74 = vector.broadcast %cst_37 : f32 to vector<8x1xf32>
    %cst_38 = arith.constant 0.000000e+00 : f32
    %75 = vector.broadcast %cst_38 : f32 to vector<8x8xf32>
    %c0_39 = arith.constant 0 : index
    %c48 = arith.constant 48 : index
    %76 = vector.load %arg13[%c0_39, %c48] : memref<8x96xf32, #tpu.memory_space<vmem>>, vector<8x8xf32>
    %c0_40 = arith.constant 0 : index
    %c80 = arith.constant 80 : index
    %77 = vector.load %arg13[%c0_40, %c80] : memref<8x96xf32, #tpu.memory_space<vmem>>, vector<8x8xf32>
    %cst_41 = arith.constant dense<0.000000e+00> : vector<8x8xf32>
    %78 = tpu.matmul %72, %76, %cst_41 {dimension_numbers = #tpu.dot_dimension_numbers<[1], [1], [0], [0], [0, 0, 1, 0], [], []>} : vector<8x8xf32>, vector<8x8xf32>, vector<8x8xf32> -> vector<8x8xf32>
    %cst_42 = arith.constant dense<0xFF800000> : vector<8xf32>
    %79 = vector.multi_reduction <maximumf>, %78, %cst_42 [1] : vector<8x8xf32> to vector<8xf32>
    %80 = vector.shape_cast %79 : vector<8xf32> to vector<8x1xf32>
    %81 = arith.maximumf %73, %80 : vector<8x1xf32>
    %82 = arith.subf %73, %81 : vector<8x1xf32>
    %83 = math.exp %82 : vector<8x1xf32>
    %84 = vector.broadcast %81 : vector<8x1xf32> to vector<8x8xf32>
    %85 = arith.subf %78, %84 : vector<8x8xf32>
    %86 = math.exp %85 : vector<8x8xf32>
    %87 = arith.mulf %83, %74 : vector<8x1xf32>
    %cst_43 = arith.constant dense<0.000000e+00> : vector<8xf32>
    %88 = vector.multi_reduction <add>, %86, %cst_43 [1] : vector<8x8xf32> to vector<8xf32>
    %89 = vector.shape_cast %88 : vector<8xf32> to vector<8x1xf32>
    %90 = arith.addf %87, %89 : vector<8x1xf32>
    %91 = vector.broadcast %83 : vector<8x1xf32> to vector<8x8xf32>
    %92 = arith.mulf %91, %75 : vector<8x8xf32>
    %cst_44 = arith.constant dense<0.000000e+00> : vector<8x8xf32>
    %93 = tpu.matmul %86, %77, %cst_44 {dimension_numbers = #tpu.dot_dimension_numbers<[1], [0], [0], [1], [0, 0, 1, 1], [], []>} : vector<8x8xf32>, vector<8x8xf32>, vector<8x8xf32> -> vector<8x8xf32>
    %94 = arith.addf %92, %93 : vector<8x8xf32>
    %95 = tpu.reciprocal %90 {approx = true} : vector<8x1xf32> -> vector<8x1xf32>
    %96 = arith.mulf %90, %95 : vector<8x1xf32>
    %cst_45 = arith.constant 2.000000e+00 : f32
    %97 = vector.broadcast %cst_45 : f32 to vector<8x1xf32>
    %98 = arith.subf %97, %96 : vector<8x1xf32>
    %99 = arith.mulf %95, %98 : vector<8x1xf32>
    %100 = vector.broadcast %99 : vector<8x1xf32> to vector<8x8xf32>
    %101 = arith.mulf %94, %100 : vector<8x8xf32>
    %c0_46 = arith.constant 0 : index
    %c16_47 = arith.constant 16 : index
    %102 = vector.load %arg14[%c0_46, %c16_47] : memref<8x32xf32, #tpu.memory_space<vmem>>, vector<8x8xf32>
    tpu.vector_store %arg14[%c0_46, %c16_47], %101 {strides = array<i32>} : memref<8x32xf32, #tpu.memory_space<vmem>>, vector<8x8xf32>,
    %c0_48 = arith.constant 0 : index
    %c24 = arith.constant 24 : index
    %103 = vector.load %arg13[%c0_48, %c24] : memref<8x96xf32, #tpu.memory_space<vmem>>, vector<8x8xf32>
    %cst_49 = arith.constant 0xFF800000 : f32
    %104 = vector.broadcast %cst_49 : f32 to vector<8x1xf32>
    %cst_50 = arith.constant 0.000000e+00 : f32
    %105 = vector.broadcast %cst_50 : f32 to vector<8x1xf32>
    %cst_51 = arith.constant 0.000000e+00 : f32
    %106 = vector.broadcast %cst_51 : f32 to vector<8x8xf32>
    %c0_52 = arith.constant 0 : index
    %c56 = arith.constant 56 : index
    %107 = vector.load %arg13[%c0_52, %c56] : memref<8x96xf32, #tpu.memory_space<vmem>>, vector<8x8xf32>
    %c0_53 = arith.constant 0 : index
    %c88 = arith.constant 88 : index
    %108 = vector.load %arg13[%c0_53, %c88] : memref<8x96xf32, #tpu.memory_space<vmem>>, vector<8x8xf32>
    %cst_54 = arith.constant dense<0.000000e+00> : vector<8x8xf32>
    %109 = tpu.matmul %103, %107, %cst_54 {dimension_numbers = #tpu.dot_dimension_numbers<[1], [1], [0], [0], [0, 0, 1, 0], [], []>} : vector<8x8xf32>, vector<8x8xf32>, vector<8x8xf32> -> vector<8x8xf32>
    %cst_55 = arith.constant dense<0xFF800000> : vector<8xf32>
    %110 = vector.multi_reduction <maximumf>, %109, %cst_55 [1] : vector<8x8xf32> to vector<8xf32>
    %111 = vector.shape_cast %110 : vector<8xf32> to vector<8x1xf32>
    %112 = arith.maximumf %104, %111 : vector<8x1xf32>
    %113 = arith.subf %104, %112 : vector<8x1xf32>
    %114 = math.exp %113 : vector<8x1xf32>
    %115 = vector.broadcast %112 : vector<8x1xf32> to vector<8x8xf32>
    %116 = arith.subf %109, %115 : vector<8x8xf32>
    %117 = math.exp %116 : vector<8x8xf32>
    %118 = arith.mulf %114, %105 : vector<8x1xf32>
    %cst_56 = arith.constant dense<0.000000e+00> : vector<8xf32>
    %119 = vector.multi_reduction <add>, %117, %cst_56 [1] : vector<8x8xf32> to vector<8xf32>
    %120 = vector.shape_cast %119 : vector<8xf32> to vector<8x1xf32>
    %121 = arith.addf %118, %120 : vector<8x1xf32>
    %122 = vector.broadcast %114 : vector<8x1xf32> to vector<8x8xf32>
    %123 = arith.mulf %122, %106 : vector<8x8xf32>
    %cst_57 = arith.constant dense<0.000000e+00> : vector<8x8xf32>
    %124 = tpu.matmul %117, %108, %cst_57 {dimension_numbers = #tpu.dot_dimension_numbers<[1], [0], [0], [1], [0, 0, 1, 1], [], []>} : vector<8x8xf32>, vector<8x8xf32>, vector<8x8xf32> -> vector<8x8xf32>
    %125 = arith.addf %123, %124 : vector<8x8xf32>
    %126 = tpu.reciprocal %121 {approx = true} : vector<8x1xf32> -> vector<8x1xf32>
    %127 = arith.mulf %121, %126 : vector<8x1xf32>
    %cst_58 = arith.constant 2.000000e+00 : f32
    %128 = vector.broadcast %cst_58 : f32 to vector<8x1xf32>
    %129 = arith.subf %128, %127 : vector<8x1xf32>
    %130 = arith.mulf %126, %129 : vector<8x1xf32>
    %131 = vector.broadcast %130 : vector<8x1xf32> to vector<8x8xf32>
    %132 = arith.mulf %125, %131 : vector<8x8xf32>
    %c0_59 = arith.constant 0 : index
    %c24_60 = arith.constant 24 : index
    %133 = vector.load %arg14[%c0_59, %c24_60] : memref<8x32xf32, #tpu.memory_space<vmem>>, vector<8x8xf32>
    tpu.vector_store %arg14[%c0_59, %c24_60], %132 {strides = array<i32>} : memref<8x32xf32, #tpu.memory_space<vmem>>, vector<8x8xf32>,
    %c0_61 = arith.constant 0 : index
    %c0_62 = arith.constant 0 : index
    %134 = vector.load %arg14[%c0_61, %c0_62] : memref<8x32xf32, #tpu.memory_space<vmem>>, vector<8x32xf32>
    %c0_63 = arith.constant 0 : index
    %c0_64 = arith.constant 0 : index
    %135 = vector.load %arg4[%c0_63, %c0_64] : memref<32x32xf32, #tpu.memory_space<vmem>>, vector<32x32xf32>
    %cst_65 = arith.constant dense<0.000000e+00> : vector<8x32xf32>
    %136 = tpu.matmul %134, %135, %cst_65 {dimension_numbers = #tpu.dot_dimension_numbers<[1], [0], [0], [1], [0, 0, 1, 1], [], []>} : vector<8x32xf32>, vector<32x32xf32>, vector<8x32xf32> -> vector<8x32xf32>
    %c0_66 = arith.constant 0 : index
    %c0_67 = arith.constant 0 : index
    %137 = vector.load %arg5[%c0_66, %c0_67] : memref<1x32xf32, #tpu.memory_space<vmem>>, vector<1x32xf32>
    %138 = vector.shape_cast %137 : vector<1x32xf32> to vector<32xf32>
    %139 = vector.shape_cast %138 : vector<32xf32> to vector<1x32xf32>
    %140 = vector.broadcast %139 : vector<1x32xf32> to vector<8x32xf32>
    %141 = arith.addf %136, %140 : vector<8x32xf32>
    %c0_68 = arith.constant 0 : index
    %c0_69 = arith.constant 0 : index
    %c0_70 = arith.constant 0 : index
    %142 = vector.load %arg1[%c0_68, %c0_69, %c0_70] : memref<1x8x32xf32, #tpu.memory_space<vmem>>, vector<1x8x32xf32>
    %143 = vector.shape_cast %142 : vector<1x8x32xf32> to vector<8x32xf32>
    %144 = arith.addf %143, %141 : vector<8x32xf32>
    %cst_71 = arith.constant dense<0.000000e+00> : vector<8xf32>
    %145 = vector.multi_reduction <add>, %144, %cst_71 [1] : vector<8x32xf32> to vector<8xf32>
    %146 = vector.shape_cast %145 : vector<8xf32> to vector<8x1xf32>
    %cst_72 = arith.constant 3.200000e+01 : f32
    %147 = vector.broadcast %cst_72 : f32 to vector<8x1xf32>
    %148 = arith.divf %146, %147 : vector<8x1xf32>
    %149 = vector.broadcast %148 : vector<8x1xf32> to vector<8x32xf32>
    %150 = arith.subf %144, %149 : vector<8x32xf32>
    %151 = arith.mulf %150, %150 : vector<8x32xf32>
    %cst_73 = arith.constant dense<0.000000e+00> : vector<8xf32>
    %152 = vector.multi_reduction <add>, %151, %cst_73 [1] : vector<8x32xf32> to vector<8xf32>
    %153 = vector.shape_cast %152 : vector<8xf32> to vector<8x1xf32>
    %cst_74 = arith.constant 3.200000e+01 : f32
    %154 = vector.broadcast %cst_74 : f32 to vector<8x1xf32>
    %155 = arith.divf %153, %154 : vector<8x1xf32>
    %156 = vector.broadcast %148 : vector<8x1xf32> to vector<8x32xf32>
    %157 = arith.subf %144, %156 : vector<8x32xf32>
    %cst_75 = arith.constant 9.99999974E-6 : f32
    %158 = vector.broadcast %cst_75 : f32 to vector<8x1xf32>
    %159 = arith.addf %155, %158 : vector<8x1xf32>
    %160 = math.rsqrt %159 : vector<8x1xf32>
    %161 = vector.broadcast %160 : vector<8x1xf32> to vector<8x32xf32>
    %162 = arith.mulf %157, %161 : vector<8x32xf32>
    %c0_76 = arith.constant 0 : index
    %c0_77 = arith.constant 0 : index
    %163 = vector.load %arg8[%c0_76, %c0_77] : memref<1x32xf32, #tpu.memory_space<vmem>>, vector<1x32xf32>
    %164 = vector.shape_cast %163 : vector<1x32xf32> to vector<32xf32>
    %165 = vector.shape_cast %164 : vector<32xf32> to vector<1x32xf32>
    %166 = vector.broadcast %165 : vector<1x32xf32> to vector<8x32xf32>
    %167 = arith.mulf %162, %166 : vector<8x32xf32>
    %c0_78 = arith.constant 0 : index
    %c0_79 = arith.constant 0 : index
    %168 = vector.load %arg9[%c0_78, %c0_79] : memref<1x32xf32, #tpu.memory_space<vmem>>, vector<1x32xf32>
    %169 = vector.shape_cast %168 : vector<1x32xf32> to vector<32xf32>
    %170 = vector.shape_cast %169 : vector<32xf32> to vector<1x32xf32>
    %171 = vector.broadcast %170 : vector<1x32xf32> to vector<8x32xf32>
    %172 = arith.addf %167, %171 : vector<8x32xf32>
    %c0_80 = arith.constant 0 : index
    %c0_81 = arith.constant 0 : index
    %173 = vector.load %arg6[%c0_80, %c0_81] : memref<32x32xf32, #tpu.memory_space<vmem>>, vector<32x32xf32>
    %cst_82 = arith.constant dense<0.000000e+00> : vector<8x32xf32>
    %174 = tpu.matmul %172, %173, %cst_82 {dimension_numbers = #tpu.dot_dimension_numbers<[1], [0], [0], [1], [0, 0, 1, 1], [], []>} : vector<8x32xf32>, vector<32x32xf32>, vector<8x32xf32> -> vector<8x32xf32>
    %c0_83 = arith.constant 0 : index
    %c0_84 = arith.constant 0 : index
    %175 = vector.load %arg7[%c0_83, %c0_84] : memref<1x32xf32, #tpu.memory_space<vmem>>, vector<1x32xf32>
    %176 = vector.shape_cast %175 : vector<1x32xf32> to vector<32xf32>
    %177 = vector.shape_cast %176 : vector<32xf32> to vector<1x32xf32>
    %178 = vector.broadcast %177 : vector<1x32xf32> to vector<8x32xf32>
    %179 = arith.addf %174, %178 : vector<8x32xf32>
    %180 = arith.addf %172, %179 : vector<8x32xf32>
    %cst_85 = arith.constant dense<0.000000e+00> : vector<8xf32>
    %181 = vector.multi_reduction <add>, %180, %cst_85 [1] : vector<8x32xf32> to vector<8xf32>
    %182 = vector.shape_cast %181 : vector<8xf32> to vector<8x1xf32>
    %cst_86 = arith.constant 3.200000e+01 : f32
    %183 = vector.broadcast %cst_86 : f32 to vector<8x1xf32>
    %184 = arith.divf %182, %183 : vector<8x1xf32>
    %185 = vector.broadcast %184 : vector<8x1xf32> to vector<8x32xf32>
    %186 = arith.subf %180, %185 : vector<8x32xf32>
    %187 = arith.mulf %186, %186 : vector<8x32xf32>
    %cst_87 = arith.constant dense<0.000000e+00> : vector<8xf32>
    %188 = vector.multi_reduction <add>, %187, %cst_87 [1] : vector<8x32xf32> to vector<8xf32>
    %189 = vector.shape_cast %188 : vector<8xf32> to vector<8x1xf32>
    %cst_88 = arith.constant 3.200000e+01 : f32
    %190 = vector.broadcast %cst_88 : f32 to vector<8x1xf32>
    %191 = arith.divf %189, %190 : vector<8x1xf32>
    %192 = vector.broadcast %184 : vector<8x1xf32> to vector<8x32xf32>
    %193 = arith.subf %180, %192 : vector<8x32xf32>
    %cst_89 = arith.constant 9.99999974E-6 : f32
    %194 = vector.broadcast %cst_89 : f32 to vector<8x1xf32>
    %195 = arith.addf %191, %194 : vector<8x1xf32>
    %196 = math.rsqrt %195 : vector<8x1xf32>
    %197 = vector.broadcast %196 : vector<8x1xf32> to vector<8x32xf32>
    %198 = arith.mulf %193, %197 : vector<8x32xf32>
    %c0_90 = arith.constant 0 : index
    %c0_91 = arith.constant 0 : index
    %199 = vector.load %arg10[%c0_90, %c0_91] : memref<1x32xf32, #tpu.memory_space<vmem>>, vector<1x32xf32>
    %200 = vector.shape_cast %199 : vector<1x32xf32> to vector<32xf32>
    %201 = vector.shape_cast %200 : vector<32xf32> to vector<1x32xf32>
    %202 = vector.broadcast %201 : vector<1x32xf32> to vector<8x32xf32>
    %203 = arith.mulf %198, %202 : vector<8x32xf32>
    %c0_92 = arith.constant 0 : index
    %c0_93 = arith.constant 0 : index
    %204 = vector.load %arg11[%c0_92, %c0_93] : memref<1x32xf32, #tpu.memory_space<vmem>>, vector<1x32xf32>
    %205 = vector.shape_cast %204 : vector<1x32xf32> to vector<32xf32>
    %206 = vector.shape_cast %205 : vector<32xf32> to vector<1x32xf32>
    %207 = vector.broadcast %206 : vector<1x32xf32> to vector<8x32xf32>
    %208 = arith.addf %203, %207 : vector<8x32xf32>
    %209 = vector.shape_cast %208 : vector<8x32xf32> to vector<1x8x32xf32>
    %c0_94 = arith.constant 0 : index
    %c0_95 = arith.constant 0 : index
    %c0_96 = arith.constant 0 : index
    %210 = vector.load %arg12[%c0_94, %c0_95, %c0_96] : memref<1x8x32xf32, #tpu.memory_space<vmem>>, vector<1x8x32xf32>
    tpu.vector_store %arg12[%c0_94, %c0_95, %c0_96], %209 {strides = array<i32>} : memref<1x8x32xf32, #tpu.memory_space<vmem>>, vector<1x8x32xf32>,
    return
  }
  func.func @transform_0(%arg0: i32) -> (i32, i32, i32) {
    %c0_i32 = arith.constant 0 : i32
    %c0_i32_0 = arith.constant 0 : i32
    %c0_i32_1 = arith.constant 0 : i32
    return %arg0, %c0_i32, %c0_i32_0 : i32, i32, i32
  }
  func.func @transform_1(%arg0: i32) -> (i32, i32) {
    %c0_i32 = arith.constant 0 : i32
    %c0_i32_0 = arith.constant 0 : i32
    %c0_i32_1 = arith.constant 0 : i32
    return %c0_i32, %c0_i32_0 : i32, i32
  }
  func.func @transform_2(%arg0: i32) -> (i32, i32) {
    %c0_i32 = arith.constant 0 : i32
    %c0_i32_0 = arith.constant 0 : i32
    %c0_i32_1 = arith.constant 0 : i32
    return %c0_i32, %c0_i32_0 : i32, i32
  }
  func.func @transform_3(%arg0: i32) -> (i32, i32) {
    %c0_i32 = arith.constant 0 : i32
    %c0_i32_0 = arith.constant 0 : i32
    %c0_i32_1 = arith.constant 0 : i32
    return %c0_i32, %c0_i32_0 : i32, i32
  }
  func.func @transform_4(%arg0: i32) -> (i32, i32) {
    %c0_i32 = arith.constant 0 : i32
    %c0_i32_0 = arith.constant 0 : i32
    %c0_i32_1 = arith.constant 0 : i32
    return %c0_i32, %c0_i32_0 : i32, i32
  }
  func.func @transform_5(%arg0: i32) -> (i32, i32) {
    %c0_i32 = arith.constant 0 : i32
    %c0_i32_0 = arith.constant 0 : i32
    %c0_i32_1 = arith.constant 0 : i32
    return %c0_i32, %c0_i32_0 : i32, i32
  }
  func.func @transform_6(%arg0: i32) -> (i32, i32) {
    %c0_i32 = arith.constant 0 : i32
    %c0_i32_0 = arith.constant 0 : i32
    %c0_i32_1 = arith.constant 0 : i32
    return %c0_i32, %c0_i32_0 : i32, i32
  }
  func.func @transform_7(%arg0: i32) -> (i32, i32) {
    %c0_i32 = arith.constant 0 : i32
    %c0_i32_0 = arith.constant 0 : i32
    %c0_i32_1 = arith.constant 0 : i32
    return %c0_i32, %c0_i32_0 : i32, i32
  }
  func.func @transform_8(%arg0: i32) -> (i32, i32) {
    %c0_i32 = arith.constant 0 : i32
    %c0_i32_0 = arith.constant 0 : i32
    %c0_i32_1 = arith.constant 0 : i32
    return %c0_i32, %c0_i32_0 : i32, i32
  }
  func.func @transform_9(%arg0: i32) -> (i32, i32) {
    %c0_i32 = arith.constant 0 : i32
    %c0_i32_0 = arith.constant 0 : i32
    %c0_i32_1 = arith.constant 0 : i32
    return %c0_i32, %c0_i32_0 : i32, i32
  }
  func.func @transform_10(%arg0: i32) -> (i32, i32) {
    %c0_i32 = arith.constant 0 : i32
    %c0_i32_0 = arith.constant 0 : i32
    %c0_i32_1 = arith.constant 0 : i32
    return %c0_i32, %c0_i32_0 : i32, i32
  }
  func.func @transform_11(%arg0: i32) -> (i32, i32, i32) {
    %c0_i32 = arith.constant 0 : i32
    %c0_i32_0 = arith.constant 0 : i32
    %c0_i32_1 = arith.constant 0 : i32
    return %arg0, %c0_i32, %c0_i32_0 : i32, i32, i32
  }
}

</mosaic_0001>

<bundles_post_ra>
// kernel: tpu_custom_call.1
= control target key start
LH: loop header
LB: loop body
LE: loop exit
PB: predicated region body
PF: predicated region fallthrough
CT: control target
= control target key end

     0   :  { %s2408_s0 = inlined_call_operand.hbm [shape: f32[2,8,32], index: 0, kind: input, shape index: {}]   ;;  %s2409_s1 = inlined_call_operand.hbm [shape: f32[32,96], index: 1, kind: input, shape index: {}]   ;;  %s2410_s2 = inlined_call_operand.vmem [shape: f32[1,96], index: 2, kind: input, shape index: {}]   ;;  %s2411_s3 = inlined_call_operand.hbm [shape: f32[32,32], index: 3, kind: input, shape index: {}]   ;;  %s2412_s4 = inlined_call_operand.vmem [shape: f32[1,32], index: 4, kind: input, shape index: {}]   ;;  %s2413_s5 = inlined_call_operand.hbm [shape: f32[32,32], index: 5, kind: input, shape index: {}]   ;;  %s2414_s6 = inlined_call_operand.vmem [shape: f32[1,32], index: 6, kind: input, shape index: {}]   ;;  %s2415_s7 = inlined_call_operand.vmem [shape: f32[1,32], index: 7, kind: input, shape index: {}]   ;;  %s2416_s8 = inlined_call_operand.vmem [shape: f32[1,32], index: 8, kind: input, shape index: {}]   ;;  %s2417_s9 = inlined_call_operand.vmem [shape: f32[1,32], index: 9, kind: input, shape index: {}]   ;;  %s2418_s10 = inlined_call_operand.vmem [shape: f32[1,32], index: 10, kind: input, shape index: {}]   ;;  %s2419_s11 = inlined_call_operand.hbm [shape: f32[2,8,32], index: 11, kind: output, shape index: {}]  }
   0x1   :  { %2427 = sst [smem:[#allocation20_spill]] %s2409_s1 }
   0x2   :  { %2428 = sst [smem:[#allocation21_spill]] %s2411_s3 }
   0x3   :  { %2429 = sst [smem:[#allocation22_spill]] %s2413_s5 }
   0x4   :  { %16 = vsyncpa [#allocation5], 0 }
   0x5   :  { %18 = vsyncpa [#allocation5 + $0x1], 0 }
   0x6   :  { %19 = vsyncpa [#allocation8], 0 }
   0x7   :  { %20 = vsyncpa [#allocation11], 0 }
   0x8   :  { %21 = vsyncpa [#allocation6], 0 }
   0x9   :  { %23 = vsyncpa [#allocation6 + $0x1], 0  ;;  %s2131_s17 = smov 0   ;;  %s2133_s18 = smov 0  }
   0xa   :  { %s2135_s19 = smov 0   ;;  %s2137_s20 = smov 0  }
   0xb LB: > { %2430 = sst [smem:[#allocation17_spill]] %s2042_s19  ;;  %s2152_s21 = sadd.s32 4294967295, %s2046_s20   ;;  %s2046_s20 = sphi %s2137_s20, %s2452_s20   ;;  %s2042_s19 = sphi %s2135_s19, %s2454_s19   ;;  %s2038_s18 = sphi %s2133_s18, %s2456_s18   ;;  %s2034_s17 = sphi %s2131_s17, %s2455_s17  }
   0xc   : > { %s1601_s22 = sadd.s32 4294967294, %s2046_s20   ;;  %p49_p0 = scmp.ne.s32.totalorder %s2038_s18, %s2034_s17 }
   0xd   : > { %p2420_p1 = scmp.eq.s32.totalorder %s2152_s21, 0  ;;  %p289_p3 = scmp.eq.s32.totalorder %s1601_s22, 1 }
   0xe   : > { %p1602_p5 = scmp.ge.s32.totalorder %s2046_s20, 1  ;;  %p296_p7 = scmp.lt.s32.totalorder %s2046_s20, 3 }
   0xf   : > { %p2161_p4 = por %p2420_p1, %p49_p0  ;;  %p2166_p6 = por %p289_p3, %p49_p0 }
  0x10   : > { %p2171_p8 = pnand %p1602_p5, %p296_p7  ;;  %s2048_s26 = smov [#allocation7]  }
  0x11   : > { %s2431_s23 = scalar_select %p2161_p4, 1, 0 }
  0x12   : > { %s2432_s24 = scalar_select %p2166_p6, 1, 0 }
  0x13   : > { %s2433_s25 = scalar_select %p2171_p8, 1, 0 }
  0x14   : > { %s308_s27 = sshll.u32 %s2048_s26, 4  ;;  %p1761_p9 = pneg %p2171_p8  ;;  %s309_s27 = int_to_ptr.vmem [resolvable:$true] %s308_s27 }
  0x15   : > { %s2049_s29 = smov [#allocation9]   ;;  %s2050_s12 = smov [#allocation10]  }
  0x16   : > { %p2180_p11 = pnand %p1761_p9, %p2420_p1  ;;  %s324_s30 = sshll.u32 %s2049_s29, 4  ;;  %s325_s30 = int_to_ptr.vmem [resolvable:$true] %s324_s30 }
  0x17   : > { %s340_s13 = sshll.u32 %s2050_s12, 4  ;;  %s1879_s14 = scalar_lea.vmem %s309_s27, 512  ;;  %s341_s13 = int_to_ptr.vmem [resolvable:$true] %s340_s13 }
  0x18   : > { %p1870_p12 = pneg %p2180_p11  ;;  %p1880_p13 = scmp.ne.s32.totalorder %s309_s27, %s1879_s14 }
  0x19   : > { %p1887_p5 = scmp.lt.s32.totalorder %s309_s27, %s309_s27  ;;  %p1888_p7 = scmp.lt.s32.totalorder %s1879_s14, %s1879_s14 }
  0x1a   : > { %p1882_p0 = pnand %p1880_p13, %p1870_p12 }
  0x1b   : > { %p1889_p9 = por %p1888_p7, %p1887_p5 }
  0x1c   : > { %p1883_p3 = pneg %p1882_p0 }
  0x1e   : > { %p1890_p10 = pnand %p1889_p9, %p1883_p3 }
  0x20   : > { %1893 = shalt.err (!%p1890_p10)
}
  0x21   : > { %s2051_s15 = smov 128   ;;  %s2052_s16 = smov 8  }
  0x22   : > { %s2435_s1 = sld [smem:[#allocation20_spill]]  ;;  %s1905_s29 = scalar_lea.vmem %s325_s30, 512 }
  0x23   : > { %p1906_p1 = scmp.ne.s32.totalorder %s325_s30, %s1905_s29  ;;  %p1913_p2 = scmp.lt.s32.totalorder %s325_s30, %s325_s30 }
  0x24   : > { %p1914_p6 = scmp.lt.s32.totalorder %s1905_s29, %s1905_s29 }
  0x25   : > { %p1908_p13 = pnand %p1906_p1, %p1870_p12 }
  0x26   : > { %p1915_p5 = por %p1914_p6, %p1913_p2 }
  0x27   : > { %p1909_p0 = pneg %p1908_p13 }
  0x28   : > { %1764 = dma.hbm_to_vmem [thread:$0]  (!%p2180_p11), %s2435_s1, 512, %s309_s27, [#allocation8], %s2051_s15, %s2051_s15, %s2052_s16  }
  0x29   : > { %p1916_p3 = pnand %p1915_p5, %p1909_p0 }
  0x2b   : > { %1919 = shalt.err (!%p1916_p3)
}
  0x2c   : > { %s2436_s3 = sld [smem:[#allocation21_spill]]  ;;  %s1931_s27 = scalar_lea.vmem %s341_s13, 512 }
  0x2d   : > { %p1932_p10 = scmp.ne.s32.totalorder %s341_s13, %s1931_s27  ;;  %p1939_p9 = scmp.lt.s32.totalorder %s341_s13, %s341_s13 }
  0x2e   : > { %p1940_p13 = scmp.lt.s32.totalorder %s1931_s27, %s1931_s27 }
  0x2f   : > { %p1934_p7 = pnand %p1932_p10, %p1870_p12 }
  0x30   : > { %p1941_p4 = por %p1940_p13, %p1939_p9 }
  0x31   : > { %p1935_p1 = pneg %p1934_p7 }
  0x32   : > { %1767 = dma.hbm_to_vmem [thread:$0]  (!%p2180_p11), %s2436_s3, 512, %s325_s30, [#allocation8], %s2051_s15, %s2051_s15, %s2052_s16  }
  0x33   : > { %p1942_p2 = pnand %p1941_p4, %p1935_p1 }
  0x35   : > { %1945 = shalt.err (!%p1942_p2)
}
  0x36   : > { %s2437_s5 = sld [smem:[#allocation22_spill]]  ;;  %s2211_s30 = sadd.s32 1, %s2046_s20  }
  0x37   : > { %2438 = sst [smem:[#allocation18_spill]] %s2211_s30  ;;  %s33_s29 = ssub.s32 %s2046_s20, %s2211_s30 }
  0x38   : > { %s36_s28 = sadd.s32 1, %s2042_s19  ;;  %p34_p4 = scmp.eq.s32.totalorder %s33_s29, 0 }
  0x39   : > { %p43_p6 = scmp.ne.s32.totalorder %s2042_s19, %s2038_s18  ;;  %p44_p12 = scmp.eq.s32.totalorder %s2046_s20, 0 }
  0x3a   : > { %p1782_p0 = scmp.lt.s32.totalorder %s2046_s20, 2  ;;  %p2440_p3 = scmp.eq.s32.totalorder %s2152_s21, 1 }
  0x3b   : > { %s2221_s12 = scalar_select %p34_p4, %s2042_s19, %s36_s28  }
  0x3c   : > { %1770 = dma.hbm_to_vmem [thread:$0]  (!%p2180_p11), %s2437_s5, 512, %s341_s13, [#allocation11], %s2051_s15, %s2051_s15, %s2052_s16  }
  0x3d   : > { %2439 = sst [smem:[#allocation19_spill]] %s2221_s12  ;;  %p45_p5 = por %p44_p12, %p43_p6 }
  0x3e   : > { %p2225_p10 = por %p2440_p3, %p43_p6  ;;  %s369_s27 = sand.u32 1, %s2042_s19  }
  0x3f   : > { %s1608_s22 = sshll.u32 %s2046_s20, 7  ;;  %s1607_s13 = sshll.u32 %s369_s27, 3 }
  0x40   : > { %s2441_s14 = scalar_select %p2225_p10, 1, 0 }
  0x41   : > { %s2234_s26 = scalar_lea.hbm %s2408_s0, %s1608_s22  ;;  %s373_s29 = scalar_lea.vmem [#allocation4], %s1607_s13 }
  0x42   : > { %s380_s28 = sshll.u32 %s373_s29, 4  ;;  %p2236_p11 = pnand %p1782_p0, %p45_p5  ;;  %s381_s28 = int_to_ptr.vmem [resolvable:$true] %s380_s28 }
  0x43   : > { %s370_s3 = scalar_lea.sflag [#allocation5], %s369_s27  ;;  %s1946_s5 = scalar_lea.hbm %s2234_s26, 128 }
  0x44   : > { %p1947_p7 = scmp.ne.s32.totalorder %s2234_s26, %s1946_s5  ;;  %p1948_p1 = pneg %p2236_p11 }
  0x45   : > { %s1951_s16 = scalar_lea.hbm %s2408_s0, 256  ;;  %p1952_p2 = scmp.lt.s32.totalorder %s2234_s26, %s2408_s0 }
  0x46   : > { %p1949_p9 = pnand %p1948_p1, %p1947_p7  ;;  %p1953_p4 = scmp.lt.s32.totalorder %s1951_s16, %s1946_s5 }
  0x48   : > { %p1950_p13 = pneg %p1949_p9  ;;  %p1954_p6 = por %p1953_p4, %p1952_p2 }
  0x4a   : > { %p1955_p12 = pnand %p1954_p6, %p1950_p13 }
  0x4c   : > { %1958 = shalt.err (!%p1955_p12)
}
  0x4d   : > { %s1959_s29 = scalar_lea.vmem %s381_s28, 128  ;;  %s2053_s27 = smov [#allocation4]  }
  0x4e   : > { %p1960_p0 = scmp.ne.s32.totalorder %s381_s28, %s1959_s29  ;;  %s1964_s19 = sshll.u32 %s2053_s27, 4  ;;  %s1965_s19 = int_to_ptr.vmem [resolvable:$false] %s1964_s19 }
  0x4f   : > { %s1966_s30 = scalar_lea.vmem %s1965_s19, 256  ;;  %p1967_p7 = scmp.lt.s32.totalorder %s381_s28, %s1965_s19 }
  0x50   : > { %p1962_p5 = pnand %p1960_p0, %p1948_p1  ;;  %p1968_p9 = scmp.lt.s32.totalorder %s1966_s30, %s1959_s29 }
  0x52   : > { %p1963_p3 = pneg %p1962_p5  ;;  %p1969_p10 = por %p1968_p9, %p1967_p7 }
  0x54   : > { %p1970_p8 = pnand %p1969_p10, %p1963_p3 }
  0x56   : > { %1973 = shalt.err (!%p1970_p8)
}
  0x57   : > { %1774 = dma.hbm_to_vmem [thread:$0]  (!%p2236_p11), %s2234_s26, 128, %s381_s28, %s370_s3  }
  0x58   : > { %p2443_p13 = scmp.ne.s32.totalorder %s2433_s25, 0 }
  0x59   : > { %s2257_s5 = sand.u32 (!%p2443_p13), 1, %s2038_s18   ;;  %p2444_p10 = scmp.ne.s32.totalorder (!%p2443_p13), %s2431_s23, 0 }
  0x5a   : > { %389 = sbr.rel (%p2443_p13) target bundleno = 2179 (0x883), region = 64  ;;  %s1610_s12 = sshll.u32 (!%p2443_p13), %s2257_s5, 3 }
  0x5b   : > { %s392_s19 = scalar_lea.sflag (!%p2443_p13), [#allocation5], %s2257_s5  ;;  %s395_s30 = scalar_lea.vmem (!%p2443_p13), [#allocation4], %s1610_s12 }
  0x5f   : > { %2017 = dma.done.wait (%p2444_p10), %s392_s19, 128  }
  0x60   : > { %2019 = vsyncadd (%p2444_p10), %s392_s19, 4294967168  ;;  %p2445_p8 = scmp.eq.s32.totalorder %s2152_s21, 0 }
  0x62   : > { %2021 = dma.done.wait (%p2445_p8), [#allocation8], 1024   ;;  %p2446_p11 = pmov %p2445_p8 }
  0x63   : > { %p2447_p1 = pmov %p2445_p8 }
  0x64   : > { %2023 = vsyncadd (%p2446_p11), [#allocation8], 4294966272 }
  0x65   : > { %2025 = dma.done.wait (%p2447_p1), [#allocation11], 512   ;;  %p2448_p2 = pmov %p2447_p1 }
  0x66   : > { %v2054_v0 = vmov 0.0   ;;  %vm2055_vm0 = vmmov 0   ;;  %v450_v1 = vld [vmem:[#allocation7 + $0x18] sm:$0xff]  ;;  %v449_v2 = vld [vmem:[#allocation7 + $0x10] sm:$0xff]  ;;  %v448_v3 = vld [vmem:[#allocation7 + $0x8] sm:$0xff]  ;;  %vm458_vm1 = vcmask 261120  }
  0x67   : > { %2027 = vsyncadd (%p2448_p2), [#allocation11], 4294966784  ;;  %1672 = vmatprep.subr.mxu0 %v2054_v0  ;;  %1680 = vmatprep.mubr.msk.f32.mxu0 %vm2055_vm0, %v2054_v0  ;;  %v447_v4 = vld [vmem:[#allocation7] sm:$0xff]  ;;  %v2283_v5 = vld [vmem:[%s395_s30] sm:$0xff]  ;;  %vm532_vm2 = vcmask 785408   ;;  %s2056_s23 = smov 120  }
  0x68   : > { %1683 = vmatprep.subr.mxu1 %v2054_v0  ;;  %1685 = vmatprep.mubr.msk.f32.mxu1 %vm2055_vm0, %v2054_v0  ;;  %v1615_v6 = vld [vmem:[%s2410_s2] ss:$0 sm:$0xff]  ;;  %s2057_s25 = smov 96   ;;  %s2058_s26 = smov 80   ;;  %vm538_vm3 = vcmask 64512   ;;  %vm890_vm4 = vcmask 130112  }
  0x69   : > { %1673 = vmatpush3.msra.mxu0 %v450_v1  ;;  %s2059_s28 = smov 88   ;;  %s2060_s22 = smov 72   ;;  %vm1072_vm5 = vcmask 195712   ;;  %vm1254_vm6 = vcmask 261312  }
  0x6a   : > { %1674 = vmatprep.subr.mxu0 %v2054_v0  ;;  %s2061_s15 = smov 112   ;;  %s2062_s16 = smov 104  }
  0x6b   : > { %1675 = vmatpush3.msra.mxu0 %v449_v2  ;;  %s2063_s13 = smov 56   ;;  %s2064_s29 = smov 64  }
  0x6c   : > { %1676 = vmatprep.subr.mxu0 %v2054_v0  ;;  %s2065_s27 = smov 40   ;;  %s2066_s19 = smov 48  }
  0x6d   : > { %1677 = vmatpush3.msra.mxu0 %v448_v3  ;;  %s2067_s30 = smov 8   ;;  %s2068_s1 = smov 16  }
  0x6e   : > { %1678 = vmatprep.subr.mxu0 %v2054_v0  ;;  %s2069_s3 = smov 24   ;;  %p2449_p6 = scmp.ne.s32.totalorder %s2441_s14, 0 }
  0x6f   : > { %1679 = vmatpush3.msra.mxu0 %v447_v4 }
  0x70   : > { %1681 = vmatmul.mubr.msk.f32.vlgmr.msra.gmra.mxu0 %vm458_vm1, %v2283_v5  ;;  %1693 = vmatprep.subr.mxu0 %v2054_v0 }
  0x71   : > { %1695 = vmatprep.mubr.msk.f32.mxu0 %vm2055_vm0, %v2054_v0 }
 0x130   : > { %v528_v7 = vpop.f32.mrf.mxu0 }
 0x131   : > { %v529_v8 = vadd.f32 %v1615_v6, %v528_v7 }
 0x132   : > { %v1682_v9 = vpop.f32.mrf.mxu0 }
 0x133   : > { %533 = vst.msk [vmem:[#allocation2] sm:$0xff] %vm532_vm2, %v529_v8 }
 0x13a   : > { %v710_v10 = vld [vmem:[#allocation2] sm:$0xff] }
 0x13b   : > { %712 = vrot.lane.b32.xlu1 %v710_v10, %s2056_s23  ;;  %536 = vrot.lane.b32.xlu0 %v710_v10, %s2057_s25 }
 0x13f   : > { %896 = vrot.lane.b32.xlu1 %v710_v10, %s2058_s26  ;;  %714 = vrot.lane.b32.xlu0 %v710_v10, %s2059_s28 }
 0x143   : > { %1078 = vrot.lane.b32.xlu1 %v710_v10, %s2060_s22  ;;  %894 = vrot.lane.b32.xlu0 %v710_v10, %s2061_s15  ;;  %s1489_s22 = scalar_lea.sflag [#allocation6], %s2257_s5 }
 0x147   : > { %1076 = vrot.lane.b32.xlu0 %v710_v10, %s2062_s16  ;;  %s2070_s16 = smov [#allocation12]  }
 0x1ad   : > { %v713_v11 = vpop.permute.xlu1 %712  ;;  %v537_v12 = vpop.permute.xlu0 %536 }
 0x1ae   : > { %1684 = vmatpush3.xpose.msk.msra.mxu1 %vm538_vm3, %v537_v12 }
 0x1af   : > { %1688 = vmatprep.subr.mxu1 %v2054_v0 }
 0x1b1   : > { %1686 = vmatmul.mubr.msk.f32.vlgmr.msra.gmra.mxu1 %vm538_vm3, %v710_v10  ;;  %v715_v13 = vpop.permute.xlu0 %714  ;;  %v897_v14 = vpop.permute.xlu1 %896 }
 0x1b2   : > { %1694 = vmatpush3.xpose.msk.msra.mxu0 %vm538_vm3, %v715_v13  ;;  %1690 = vmatprep.mubr.msk.f32.mxu1 %vm2055_vm0, %v2054_v0 }
 0x1b3   : > { %1703 = vmatprep.subr.mxu0 %v2054_v0 }
 0x1b5   : > { %1696 = vmatmul.mubr.msk.f32.vlgmr.msra.gmra.mxu0 %vm538_vm3, %v713_v11  ;;  %v895_v15 = vpop.permute.xlu0 %894  ;;  %v1079_v16 = vpop.permute.xlu1 %1078 }
 0x1b6   : > { %1704 = vmatpush3.xpose.msk.msra.mxu0 %vm538_vm3, %v897_v14  ;;  %1705 = vmatprep.mubr.msk.f32.mxu0 %vm2055_vm0, %v2054_v0 }
 0x1b7   : > { %1713 = vmatprep.subr.mxu0 %v2054_v0 }
 0x1b9   : > { %1706 = vmatmul.mubr.msk.f32.vlgmr.msra.gmra.mxu0 %vm538_vm3, %v895_v15  ;;  %v1077_v17 = vpop.permute.xlu0 %1076 }
 0x1ba   : > { %1714 = vmatpush3.xpose.msk.msra.mxu0 %vm538_vm3, %v1079_v16  ;;  %1715 = vmatprep.mubr.msk.f32.mxu0 %vm2055_vm0, %v2054_v0 }
 0x1bb   : > { %1723 = vmatprep.subr.mxu0 %v2054_v0 }
 0x1bd   : > { %1716 = vmatmul.mubr.msk.f32.vlgmr.msra.gmra.mxu0 %vm538_vm3, %v1077_v17 }
 0x1be   : > { %1731 = vmatprep.mubr.msk.f32.mxu0 %vm2055_vm0, %v2054_v0 }
 0x271   : > { %v609_v18 = vpop.f32.mrf.mxu1 }
 0x272   : > { %v613_v19 = vsel %vm538_vm3, %v609_v18, -inf }
 0x273   : > { %614 = vmax.xlane.f32.xlu1 %v613_v19  ;;  %v1687_v20 = vpop.f32.mrf.mxu1 }
 0x275   : > { %v786_v21 = vpop.f32.mrf.mxu0 }
 0x276   : > { %v790_v22 = vsel %vm538_vm3, %v786_v21, -inf }
 0x277   : > { %791 = vmax.xlane.f32.xlu0 %v790_v22  ;;  %v1697_v23 = vpop.f32.mrf.mxu0 }
 0x279   : > { %v968_v24 = vpop.f32.mrf.mxu0 }
 0x27a   : > { %v972_v25 = vsel %vm538_vm3, %v968_v24, -inf }
 0x27b   : > { %973 = vmax.xlane.f32.xlu0 %v972_v25  ;;  %v1707_v26 = vpop.f32.mrf.mxu0 }
 0x27d   : > { %v1150_v27 = vpop.f32.mrf.mxu0 }
 0x27e   : > { %v1154_v29 = vsel %vm538_vm3, %v1150_v27, -inf }
 0x27f   : > { %v1717_v28 = vpop.f32.mrf.mxu0 }
 0x284   : > { %804 = vrot.lane.b32.xlu1 %v710_v10, %s2063_s13 }
 0x291   : > { %627 = vrot.lane.b32.xlu0 %v710_v10, %s2064_s29 }
 0x295   : > { %1168 = vrot.lane.b32.xlu0 %v710_v10, %s2065_s27 }
 0x2a8   : > { %1155 = vmax.xlane.f32.xlu1 %v1154_v29 }
 0x2b9   : > { %986 = vrot.lane.b32.xlu1 %v710_v10, %s2066_s19 }
 0x2fc   : > { %v615_v30 = vpop.xlane.xlu1 %614 }
 0x2fd   : > { %v619_v31 = vsub.f32 %v609_v18, %v615_v30  ;;  %v616_v54 = vsub.f32 -inf, %v615_v30 }
 0x2ff   : > { %v620_v32 = vmul.f32 1.442695, %v619_v31  ;;  %v617_v55 = vmul.f32 1.442695, %v616_v54 }
 0x300   : > { %v792_v33 = vpop.xlane.xlu0 %791  ;;  %v805_v41 = vpop.permute.xlu1 %804 }
 0x301   : > { %v796_v34 = vsub.f32 %v786_v21, %v792_v33  ;;  %1840 = vpow2.f32 %v620_v32  ;;  %v793_v56 = vsub.f32 -inf, %v792_v33 }
 0x303   : > { %v797_v35 = vmul.f32 1.442695, %v796_v34  ;;  %v794_v57 = vmul.f32 1.442695, %v793_v56  ;;  %v1629_v56 = vld [vmem:[%s2412_s4] ss:$0 sm:$0xff] }
 0x304   : > { %v974_v36 = vpop.xlane.xlu0 %973 }
 0x305   : > { %v978_v37 = vsub.f32 %v968_v24, %v974_v36  ;;  %1842 = vpow2.f32 %v797_v35  ;;  %v975_v3 = vsub.f32 -inf, %v974_v36 }
 0x307   : > { %v979_v38 = vmul.f32 1.442695, %v978_v37  ;;  %v976_v6 = vmul.f32 1.442695, %v975_v3 }
 0x308   : > { %v628_v39 = vpop.permute.xlu0 %627 }
 0x309   : > { %1689 = vmatpush3.msra.mxu1 %v628_v39  ;;  %1844 = vpow2.f32 %v979_v38 }
 0x30a   : > { %1698 = vmatprep.subr.mxu1 %v2054_v0 }
 0x30c   : > { %v1169_v51 = vpop.permute.xlu0 %1168 }
 0x30e   : > { %v1841_v40 = vpop.eup %1840 }
 0x30f   : > { %1691 = vmatmul.mubr.msk.f32.vlgmr.msra.gmra.mxu1 %vm538_vm3, %v1841_v40  ;;  %v623_v46 = vsel %vm538_vm3, %v1841_v40, 0.0 }
 0x310   : > { %1699 = vmatpush3.msra.mxu1 %v805_v41  ;;  %1700 = vmatprep.mubr.msk.f32.mxu1 %vm2055_vm0, %v2054_v0  ;;  %v1260_v41 = vld [vmem:[#allocation9 + $0x18] sm:$0xff] }
 0x311   : > { %1708 = vmatprep.subr.mxu1 %v2054_v0  ;;  %1724 = vmatpush3.msra.mxu0 %v1260_v41 }
 0x312   : > { %v1843_v42 = vpop.eup %1842  ;;  %1725 = vmatprep.subr.mxu0 %v2054_v0 }
 0x313   : > { %1701 = vmatmul.mubr.msk.f32.vlgmr.msra.gmra.mxu1 %vm538_vm3, %v1843_v42  ;;  %v800_v43 = vsel %vm538_vm3, %v1843_v42, 0.0  ;;  %v1259_v42 = vld [vmem:[#allocation9 + $0x10] sm:$0xff] }
 0x314   : > { %801 = vadd.xlane.f32.xlu1 %v800_v43  ;;  %1710 = vmatprep.mubr.msk.f32.mxu1 %vm2055_vm0, %v2054_v0 }
 0x315   : > { %1726 = vmatpush3.msra.mxu0 %v1259_v42 }
 0x316   : > { %v1845_v44 = vpop.eup %1844  ;;  %1727 = vmatprep.subr.mxu0 %v2054_v0 }
 0x317   : > { %v982_v45 = vsel %vm538_vm3, %v1845_v44, 0.0 }
 0x318   : > { %983 = vadd.xlane.f32.xlu0 %v982_v45  ;;  %624 = vadd.xlane.f32.xlu1 %v623_v46  ;;  %v1257_v45 = vld [vmem:[#allocation9] sm:$0xff] }
 0x331   : > { %v1156_v47 = vpop.xlane.xlu1 %1155 }
 0x332   : > { %v1160_v48 = vsub.f32 %v1150_v27, %v1156_v47  ;;  %v1157_v11 = vsub.f32 -inf, %v1156_v47 }
 0x334   : > { %v1161_v49 = vmul.f32 1.442695, %v1160_v48  ;;  %v1158_v18 = vmul.f32 1.442695, %v1157_v11 }
 0x335   : > { %v987_v50 = vpop.permute.xlu1 %986 }
 0x336   : > { %1709 = vmatpush3.msra.mxu1 %v987_v50  ;;  %1846 = vpow2.f32 %v1161_v49 }
 0x337   : > { %1711 = vmatmul.mubr.msk.f32.vlgmr.msra.gmra.mxu1 %vm538_vm3, %v1845_v44  ;;  %1718 = vmatprep.subr.mxu1 %v2054_v0  ;;  %1848 = vpow2.f32 %v617_v55  ;;  %v1258_v44 = vld [vmem:[#allocation9 + $0x8] sm:$0xff] }
 0x338   : > { %1719 = vmatpush3.msra.mxu1 %v1169_v51  ;;  %1720 = vmatprep.mubr.msk.f32.mxu1 %vm2055_vm0, %v2054_v0  ;;  %1850 = vpow2.f32 %v794_v57 }
 0x339   : > { %1734 = vmatprep.subr.mxu1 %v2054_v0  ;;  %1728 = vmatpush3.msra.mxu0 %v1258_v44 }
 0x33a   : > { %1729 = vmatprep.subr.mxu0 %v2054_v0 }
 0x33b   : > { %1730 = vmatpush3.msra.mxu0 %v1257_v45 }
 0x343   : > { %v1847_v52 = vpop.eup %1846 }
 0x344   : > { %1721 = vmatmul.mubr.msk.f32.vlgmr.msra.gmra.mxu1 %vm538_vm3, %v1847_v52  ;;  %v1164_v53 = vsel %vm538_vm3, %v1847_v52, 0.0  ;;  %v1849_v59 = vpop.eup %1848 }
 0x345   : > { %1165 = vadd.xlane.f32.xlu0 %v1164_v53  ;;  %1742 = vmatprep.mubr.msk.f32.mxu1 %vm2055_vm0, %v2054_v0  ;;  %v622_v61 = vmul.f32 0.0, %v1849_v59  ;;  %v1851_v62 = vpop.eup %1850 }
 0x346   : > { %v799_v1 = vmul.f32 0.0, %v1851_v62 }
 0x39d   : > { %v802_v58 = vpop.xlane.xlu1 %801 }
 0x39e   : > { %v803_v2 = vadd.f32 %v802_v58, %v799_v1 }
 0x3a1   : > { %v625_v60 = vpop.xlane.xlu1 %624  ;;  %v984_v25 = vpop.xlane.xlu0 %983 }
 0x3a2   : > { %v626_v63 = vadd.f32 %v625_v60, %v622_v61 }
 0x3a4   : > { %1852 = vrcp.f32 %v626_v63 }
 0x3a5   : > { %1854 = vrcp.f32 %v803_v2 }
 0x3a6   : > { %1856 = vpow2.f32 %v976_v6  ;;  %v1375_v6 = vld [vmem:[#allocation10 + $0x10] sm:$0xff] }
 0x3a7   : > { %1858 = vpow2.f32 %v1158_v18 }
 0x3b1   : > { %v1853_v4 = vpop.eup %1852 }
 0x3b2   : > { %v705_v7 = vmul.f32 %v1853_v4, %v626_v63  ;;  %v1855_v8 = vpop.eup %1854 }
 0x3b3   : > { %v882_v9 = vmul.f32 %v1855_v8, %v803_v2  ;;  %v1857_v23 = vpop.eup %1856 }
 0x3b4   : > { %v706_v10 = vsub.f32 2.0, %v705_v7  ;;  %v981_v26 = vmul.f32 0.0, %v1857_v23  ;;  %v1859_v28 = vpop.eup %1858  ;;  %v1374_v7 = vld [vmem:[#allocation10 + $0x8] sm:$0xff] }
 0x3b5   : > { %v883_v13 = vsub.f32 2.0, %v882_v9  ;;  %v1163_v30 = vmul.f32 0.0, %v1859_v28 }
 0x3b6   : > { %v707_v15 = vmul.f32 %v1853_v4, %v706_v10  ;;  %v985_v27 = vadd.f32 %v984_v25, %v981_v26  ;;  %v1376_v4 = vld [vmem:[#allocation10 + $0x18] sm:$0xff] }
 0x3b7   : > { %v884_v21 = vmul.f32 %v1855_v8, %v883_v13  ;;  %1735 = vmatpush3.msra.mxu1 %v1376_v4 }
 0x3b8   : > { %1860 = vrcp.f32 %v985_v27  ;;  %1736 = vmatprep.subr.mxu1 %v2054_v0 }
 0x3b9   : > { %1737 = vmatpush3.msra.mxu1 %v1375_v6 }
 0x3ba   : > { %1738 = vmatprep.subr.mxu1 %v2054_v0 }
 0x3bb   : > { %1739 = vmatpush3.msra.mxu1 %v1374_v7 }
 0x3bc   : > { %1740 = vmatprep.subr.mxu1 %v2054_v0  ;;  %v1633_v0 = vld [vmem:[%s2414_s6] ss:$0 sm:$0xff] }
 0x3c5   : > { %v1861_v32 = vpop.eup %1860 }
 0x3c6   : > { %v1064_v33 = vmul.f32 %v1861_v32, %v985_v27 }
 0x3c8   : > { %v1065_v34 = vsub.f32 2.0, %v1064_v33  ;;  %v1636_v33 = vld [vmem:[%s2418_s10] ss:$0 sm:$0xff] }
 0x3ca   : > { %v1066_v37 = vmul.f32 %v1861_v32, %v1065_v34 }
 0x3ce   : > { %v1166_v29 = vpop.xlane.xlu0 %1165 }
 0x3cf   : > { %v699_v12 = vpop.f32.mrf.mxu1  ;;  %v1167_v31 = vadd.f32 %v1166_v29, %v1163_v30 }
 0x3d0   : > { %v703_v14 = vadd.f32 %v699_v12, %v622_v61  ;;  %v1631_v12 = vld [vmem:[%s2415_s7] ss:$0 sm:$0xff] }
 0x3d1   : > { %v1692_v16 = vpop.f32.mrf.mxu1  ;;  %1862 = vrcp.f32 %v1167_v31 }
 0x3d2   : > { %v708_v17 = vmul.f32 %v707_v15, %v703_v14  ;;  %v1632_v14 = vld [vmem:[%s2416_s8] ss:$0 sm:$0xff] }
 0x3d3   : > { %v876_v19 = vpop.f32.mrf.mxu1 }
 0x3d4   : > { %709 = vst.msk [vmem:[#allocation3] sm:$0xff] %vm538_vm3, %v708_v17  ;;  %v880_v20 = vadd.f32 %v876_v19, %v799_v1 }
 0x3d5   : > { %v1702_v22 = vpop.f32.mrf.mxu1 }
 0x3d6   : > { %v885_v24 = vmul.f32 %v884_v21, %v880_v20 }
 0x3d8   : > { %887 = vrot.lane.b32.xlu0 %v885_v24, %s2067_s30 }
 0x3de   : > { %v1863_v40 = vpop.eup %1862 }
 0x3df   : > { %v1246_v43 = vmul.f32 %v1863_v40, %v1167_v31  ;;  %v1635_v31 = vld [vmem:[%s2417_s9] ss:$0 sm:$0xff] }
 0x3e1   : > { %v1247_v46 = vsub.f32 2.0, %v1246_v43 }
 0x3e3   : > { %v1248_v49 = vmul.f32 %v1863_v40, %v1247_v46 }
 0x3f7   : > { %v1058_v35 = vpop.f32.mrf.mxu1 }
 0x3f8   : > { %v1062_v36 = vadd.f32 %v1058_v35, %v981_v26 }
 0x3f9   : > { %v1712_v38 = vpop.f32.mrf.mxu1 }
 0x3fa   : > { %v1067_v39 = vmul.f32 %v1066_v37, %v1062_v36 }
 0x3fc   : > { %1069 = vrot.lane.b32.xlu1 %v1067_v39, %s2068_s1  ;;  %s1638_s1 = sshll.u32 %s2152_s21, 7  ;;  %s1978_s21 = sshll.u32 %s2070_s16, 4  ;;  %s1979_s21 = int_to_ptr.vmem [resolvable:$false] %s1978_s21 }
 0x3fd   : > { %s1500_s28 = scalar_lea.hbm %s2419_s11, %s1638_s1 }
 0x404   : > { %v1240_v47 = vpop.f32.mrf.mxu1 }
 0x405   : > { %v1244_v48 = vadd.f32 %v1240_v47, %v1163_v30 }
 0x406   : > { %v1722_v50 = vpop.f32.mrf.mxu1 }
 0x407   : > { %v1249_v51 = vmul.f32 %v1248_v49, %v1244_v48 }
 0x409   : > { %1251 = vrot.lane.b32.xlu1 %v1249_v51, %s2069_s3  ;;  %s445_s3 = scalar_lea.vmem [#allocation12], %s1610_s12  ;;  %s1980_s12 = scalar_lea.vmem %s1979_s21, 256 }
 0x40a   : > { %s1502_s23 = sshll.u32 %s445_s3, 4  ;;  %s1503_s23 = int_to_ptr.vmem [resolvable:$true] %s1502_s23 }
 0x40b   : > { %s1974_s15 = scalar_lea.vmem %s1503_s23, 128  ;;  %p1981_p5 = scmp.lt.s32.totalorder %s1503_s23, %s1979_s21 }
 0x40c   : > { %p1975_p4 = scmp.ne.s32.totalorder %s1503_s23, %s1974_s15  ;;  %p1982_p3 = scmp.lt.s32.totalorder %s1980_s12, %s1974_s15 }
 0x40e   : > { %p1976_p12 = pnand %p1975_p4, %p2449_p6  ;;  %p1983_p7 = por %p1982_p3, %p1981_p5 }
 0x410   : > { %p1977_p0 = pneg %p1976_p12 }
 0x412   : > { %p1984_p9 = pnand %p1983_p7, %p1977_p0 }
 0x44a   : > { %v888_v52 = vpop.permute.xlu0 %887 }
 0x44b   : > { %891 = vst.msk [vmem:[#allocation3] sm:$0xff] %vm890_vm4, %v888_v52 }
 0x46e   : > { %v1070_v53 = vpop.permute.xlu1 %1069 }
 0x46f   : > { %1073 = vst.msk [vmem:[#allocation3] sm:$0xff] %vm1072_vm5, %v1070_v53 }
 0x47b   : > { %v1252_v54 = vpop.permute.xlu1 %1251 }
 0x47c   : > { %1255 = vst.msk [vmem:[#allocation3] sm:$0xff] %vm1254_vm6, %v1252_v54 }
 0x483   : > { %v1256_v55 = vld [vmem:[#allocation3] sm:$0xff] }
 0x484   : > { %1732 = vmatmul.mubr.msk.f32.vlgmr.msra.gmra.mxu0 %vm458_vm1, %v1256_v55 }
 0x544   : > { %v1337_v57 = vpop.f32.mrf.mxu0 }
 0x545   : > { %v1338_v58 = vadd.f32 %v1629_v56, %v1337_v57 }
 0x546   : > { %v1733_v59 = vpop.f32.mrf.mxu0 }
 0x547   : > { %v1342_v60 = vadd.f32 %v1338_v58, %v2283_v5  ;;  %v1373_v5 = vld [vmem:[#allocation10] sm:$0xff] }
 0x548   : > { %1741 = vmatpush3.msra.mxu1 %v1373_v5 }
 0x549   : > { %v1343_v61 = vsel %vm458_vm1, %v1342_v60, 0.0 }
 0x54a   : > { %1344 = vadd.xlane.f32.xlu0 %v1343_v61 }
 0x5d3   : > { %v1345_v62 = vpop.xlane.xlu0 %1344 }
 0x5d4   : > { %v1347_v63 = vmul.f32 0.03125, %v1345_v62 }
 0x5d6   : > { %v1348_v1 = vsub.f32 %v1342_v60, %v1347_v63 }
 0x5d8   : > { %v1349_v2 = vmul.f32 %v1348_v1, %v1348_v1 }
 0x5da   : > { %v1350_v3 = vsel %vm458_vm1, %v1349_v2, 0.0 }
 0x5db   : > { %1351 = vadd.xlane.f32.xlu1 %v1350_v3 }
 0x664   : > { %v1352_v8 = vpop.xlane.xlu1 %1351 }
 0x665   : > { %v1353_v9 = vmul.f32 0.03125, %v1352_v8 }
 0x667   : > { %v1354_v10 = vadd.f32 1e-05, %v1353_v9 }
 0x669   : > { %1864 = vrsqrt.f32 %v1354_v10 }
 0x676   : > { %v1865_v11 = vpop.eup %1864 }
 0x677   : > { %v1356_v13 = vmul.f32 %v1865_v11, %v1348_v1 }
 0x679   : > { %v1364_v15 = vmul.f32 %v1631_v12, %v1356_v13 }
 0x67b   : > { %v1372_v16 = vadd.f32 %v1632_v14, %v1364_v15 }
 0x67d   : > { %1743 = vmatmul.mubr.msk.f32.vlgmr.msra.gmra.mxu1 %vm458_vm1, %v1372_v16 }
 0x73d   : > { %v1453_v17 = vpop.f32.mrf.mxu1 }
 0x73e   : > { %v1454_v18 = vadd.f32 %v1633_v0, %v1453_v17 }
 0x73f   : > { %v1744_v19 = vpop.f32.mrf.mxu1 }
 0x740   : > { %v1457_v20 = vadd.f32 %v1454_v18, %v1372_v16 }
 0x742   : > { %v1458_v21 = vsel %vm458_vm1, %v1457_v20, 0.0 }
 0x743   : > { %1459 = vadd.xlane.f32.xlu0 %v1458_v21 }
 0x7cc   : > { %v1460_v22 = vpop.xlane.xlu0 %1459 }
 0x7cd   : > { %v1461_v23 = vmul.f32 0.03125, %v1460_v22 }
 0x7cf   : > { %v1462_v24 = vsub.f32 %v1457_v20, %v1461_v23 }
 0x7d1   : > { %v1463_v25 = vmul.f32 %v1462_v24, %v1462_v24 }
 0x7d3   : > { %v1464_v26 = vsel %vm458_vm1, %v1463_v25, 0.0 }
 0x7d4   : > { %1465 = vadd.xlane.f32.xlu0 %v1464_v26 }
 0x85d   : > { %v1466_v27 = vpop.xlane.xlu0 %1465 }
 0x85e   : > { %v1467_v28 = vmul.f32 0.03125, %v1466_v27 }
 0x860   : > { %v1468_v29 = vadd.f32 1e-05, %v1467_v28 }
 0x862   : > { %1866 = vrsqrt.f32 %v1468_v29 }
 0x86f   : > { %v1867_v30 = vpop.eup %1866 }
 0x870   : > { %v1470_v32 = vmul.f32 %v1867_v30, %v1462_v24 }
 0x872   : > { %v1478_v34 = vmul.f32 %v1635_v31, %v1470_v32 }
 0x874   : > { %v1486_v35 = vadd.f32 %v1636_v33, %v1478_v34 }
 0x876   : > { %1487 = vst.msk [vmem:[%s445_s3] sm:$0xff] %vm458_vm1, %v1486_v35 }
 0x877   : > { %1987 = shalt.err (!%p1984_p9)
}
 0x878   : > { %s1988_s13 = scalar_lea.hbm %s1500_s28, 128  ;;  %s1992_s27 = scalar_lea.hbm %s2419_s11, 256 }
 0x879   : > { %p1989_p13 = scmp.ne.s32.totalorder %s1500_s28, %s1988_s13  ;;  %p1993_p11 = scmp.lt.s32.totalorder %s1500_s28, %s2419_s11 }
 0x87a   : > { %p1994_p1 = scmp.lt.s32.totalorder %s1992_s27, %s1988_s13 }
 0x87b   : > { %p1990_p10 = pnand %p1989_p13, %p2449_p6 }
 0x87c   : > { %p1995_p2 = por %p1994_p1, %p1993_p11 }
 0x87d   : > { %p1991_p8 = pneg %p1990_p10 }
 0x87f   : > { %p1996_p4 = pnand %p1995_p2, %p1991_p8 }
 0x881   : > { %1999 = shalt.err (!%p1996_p4)
}
 0x882   : > { %1759 = dma.vmem_to_hbm [thread:$0]  (%p2449_p6), %s1503_s23, 128, %s1500_s28, %s1489_s22  }
 0x883 PF: > { %s1514_s1 = sand.u32 1, %s2034_s17   ;;  %p2450_p12 = scmp.ne.s32.totalorder %s2432_s24, 0 }
 0x884   : > { %p2451_p0 = scmp.ge.s32.totalorder %s2046_s20, 2  ;;  %s1515_s3 = scalar_lea.sflag [#allocation6], %s1514_s1 }
 0x886   : > { %p1776_p5 = pnand %p2451_p0, %p2450_p12 }
 0x888   : > { %p1777_p3 = pneg %p1776_p5 }
 0x88a   : > { %2029 = dma.done.wait (%p1777_p3), %s1515_s3, 128  }
 0x88b   : > { %2031 = vsyncadd (%p1777_p3), %s1515_s3, 4294967168  ;;  %s2452_s20 = sld [smem:[#allocation18_spill]]  ;;  %s2455_s17 = smov %s2038_s18 }
 0x88c   : > { %s2453_s25 = sld [smem:[#allocation17_spill]] }
 0x88d   : > { %s2454_s19 = sld [smem:[#allocation19_spill]] }
 0x891   : > { %p26_p7 = scmp.ge.s32.totalorder %s2452_s20, 4  }
 0x892   : > { %s2456_s18 = smov %s2453_s25 }
 0x893   :  { %28 = sbr.rel (!%p26_p7) target bundleno = 11 (0xb), region = 121 }
 0x898   :  { %1520 = vsyncpa [#allocation5], 1 }
 0x899   :  { %1522 = vsyncpa [#allocation5 + $0x1], 1 }
 0x89a   :  { %1523 = vsyncpa [#allocation8], 1 }
 0x89b   :  { %1524 = vsyncpa [#allocation11], 1 }
 0x89c   :  { %1525 = vsyncpa [#allocation6], 1 }
 0x89d   :  { %1527 = vsyncpa [#allocation6 + $0x1], 1 }

</bundles_post_ra>
